<compile_context>
chip_gen: v7x
topology: tpu7x:2x2x1
jax: 0.10.0
libtpu: 0.0.40
codegen_flags: <defaults>
</compile_context>

<pallas_src>
import functools

import numpy as np
import jax
import jax.numpy as jnp
from jax.experimental import pallas as pl
from jax.experimental.pallas import tpu as pltpu


def dense_layer_kernel(x_ref, shift_ref, r_ref, b_ref, o_ref, *, H):
    """Fused BN(shift) + ReLU + 3x3 same-pad conv for a block of Nb batch elems.

    x_ref:     (Nb*H, W*C)     input slab, rows = (n, h), cols = (w, c), f32
    shift_ref: (1, W*C)        fused BN shift (= t/s, tiled over w), f32
    r_ref:     (3*W*C, W*F)    block-Toeplitz conv weights * BN scale, bf16
    b_ref:     (1, W*F)        conv bias (tiled over w), f32
    o_ref:     (Nb*H, W*F)     output slab, rows = (n, h), cols = (w, f), f32
    """
    M = x_ref.shape[0]

    # BN shift + ReLU in f32 (v5e VPU has no bf16 math).  BN scale is folded
    # into r_ref in the wrapper (valid since scale > 0 for this module).
    y = jnp.maximum(x_ref[...] + shift_ref[...], 0.0)              # (M, W*C)

    # Vertical taps via sublane roll (XLU) + per-batch-row edge masks.
    # row % H == 0 / H-1 also kills the rows that wrapped across batch elems.
    row = jax.lax.broadcasted_iota(jnp.int32, y.shape, 0)
    y_up = jnp.where(row % H == 0, 0.0, pltpu.roll(y, shift=1, axis=0))      # y[h-1]
    y_dn = jnp.where(row % H == H - 1, 0.0, pltpu.roll(y, shift=M - 1, axis=0))  # y[h+1]

    # Fuse the three dy taps into one matmul: K = 3*W*C.
    ycat = jnp.concatenate([y_up, y, y_dn], axis=1)                # (M, 3*W*C) f32
    acc = jnp.dot(ycat.astype(jnp.bfloat16), r_ref[...],           # single bf16 cast
                  preferred_element_type=jnp.float32)              # (M, W*F) f32
    o_ref[...] = (acc + b_ref[...]).astype(o_ref.dtype)


def dense_layer_forward(x_nchw, conv_weight, conv_bias,
                        bn_gamma, bn_beta, bn_mean, bn_var, eps=1e-5):
    """Wrapper: NCHW in / NCHW out, parameters in PyTorch layouts."""
    N, C, H, W = x_nchw.shape
    F = conv_weight.shape[0]
    WC, WF = W * C, W * F

    # Fuse BN (eval) into per-channel scale/shift.  scale > 0 here (gamma = 1).
    scale_c = (bn_gamma / jnp.sqrt(bn_var + eps)).astype(jnp.float32)     # (C,)
    shift_c = (bn_beta - bn_mean * scale_c).astype(jnp.float32)           # (C,)
    shift = jnp.tile(shift_c / scale_c, W).reshape(1, WC)                 # t/s, per (w,c) lane
    bias = jnp.tile(conv_bias.astype(jnp.float32), W).reshape(1, WF)

    # Block-Toeplitz conv weights with BN scale folded in:
    #   R[dy, w'*C + c, w*F + f] = s[c] * K[dy, dx, c, f],  dx = w' - w + 1 in {0,1,2}
    # out-of-range taps are zero -> W-direction zero padding lives inside the matmul.
    k_hwcf = jnp.transpose(conv_weight, (2, 3, 1, 0)).astype(jnp.float32)  # (3,3,C,F)
    k_hwcf = k_hwcf * scale_c[None, None, :, None]                         # fold BN scale
    wp = jnp.arange(W)[:, None]
    w = jnp.arange(W)[None, :]
    toep = jnp.stack([(wp == w + dx - 1).astype(jnp.float32) for dx in range(3)],
                     axis=0)                                               # (3,W,W)
    r = jnp.einsum('xpw,yxcf->ypcwf', toep, k_hwcf).reshape(3 * WC, WF)
    r = r.astype(jnp.bfloat16)                                             # (192, 256)

    # NCHW -> (N*H, W*C): rows = (n, h), channels fastest within the lane axis.
    x_rows = jnp.transpose(x_nchw, (0, 2, 3, 1)).reshape(N * H, WC).astype(jnp.float32)

    # Block Nb batch elements per grid step so matmul M = Nb*H targets the MXU
    # height (<= 256).  For N=2, H=16 this is Nb=2 -> a single grid step (M=32).
    nb = 1
    for d in range(1, N + 1):
        if N % d == 0 and d * H <= 256:
            nb = d
    grid = (N // nb,)
    MB = nb * H

    grid_spec = pltpu.PrefetchScalarGridSpec(
        num_scalar_prefetch=0,
        grid=grid,
        in_specs=[
            pl.BlockSpec((MB, WC), lambda g: (g, 0)),
            pl.BlockSpec((1, WC), lambda g: (0, 0)),
            pl.BlockSpec((3 * WC, WF), lambda g: (0, 0)),
            pl.BlockSpec((1, WF), lambda g: (0, 0)),
        ],
        out_specs=pl.BlockSpec((MB, WF), lambda g: (g, 0)),
    )

    out_rows = pl.pallas_call(
        functools.partial(dense_layer_kernel, H=H),
        out_shape=jax.ShapeDtypeStruct((N * H, WF), jnp.float32),
        grid_spec=grid_spec,
        compiler_params=pltpu.CompilerParams(
            dimension_semantics=("parallel",),       # shards batch blocks when grid > 1
            vmem_limit_bytes=32 * 1024 * 1024),      # fail loudly if R ever outgrows VMEM
    )(x_rows, shift, r, bias)

    # (N*H, W*F) -> (N, H, W, F) -> NCHW
    return jnp.transpose(out_rows.reshape(N, H, W, F), (0, 3, 1, 2))


def reference_forward(x_nchw, conv_weight, conv_bias,
                      bn_gamma, bn_beta, bn_mean, bn_var, eps=1e-5):
    """Pure-JAX f32 reference (eval-mode BN + ReLU + conv + identity dropout)."""
    s = bn_gamma / jnp.sqrt(bn_var + eps)
    y = (x_nchw - bn_mean[None, :, None, None]) * s[None, :, None, None] \
        + bn_beta[None, :, None, None]
    y = jnp.maximum(y, 0.0)
    out = jax.lax.conv_general_dilated(
        y, conv_weight, window_strides=(1, 1), padding="SAME",
        dimension_numbers=("NCHW", "OIHW", "NCHW"))
    return out + conv_bias[None, :, None, None]


if __name__ == "__main__":
    # Module config: input_depth=4, n_filters=16, filter_size=3
    N, C, H, W = 2, 4, 16, 16
    F, KH, KW = 16, 3, 3

    key = jax.random.PRNGKey(0)
    kx, kw = jax.random.split(key)

    x = jax.random.normal(kx, (N, C, H, W), dtype=jnp.float32)

    # Deterministic init matching the module's _initialize_weights:
    #   conv: kaiming_uniform (gain=sqrt(2), fan_in = C*KH*KW), bias = 0
    #   BN:   gamma = 1, beta = 0 (running stats: mean=0, var=1)
    fan_in = C * KH * KW
    bound = float(np.sqrt(2.0) * np.sqrt(3.0 / fan_in))
    conv_weight = jax.random.uniform(kw, (F, C, KH, KW),
                                     minval=-bound, maxval=bound,
                                     dtype=jnp.float32)
    conv_bias = jnp.zeros((F,), jnp.float32)
    bn_gamma = jnp.ones((C,), jnp.float32)
    bn_beta = jnp.zeros((C,), jnp.float32)
    bn_mean = jnp.zeros((C,), jnp.float32)
    bn_var = jnp.ones((C,), jnp.float32)

    out = dense_layer_forward(x, conv_weight, conv_bias,
                              bn_gamma, bn_beta, bn_mean, bn_var)
    out = jax.block_until_ready(out)

    ref = reference_forward(x, conv_weight, conv_bias,
                            bn_gamma, bn_beta, bn_mean, bn_var)
    ref = jax.block_until_ready(ref)

    assert out.shape == (N, F, H, W), out.shape
    # Kernel uses bf16 MXU operands with f32 accumulation; expected deviation
    # vs. the pure-f32 reference is ~1e-2 level.
    np.testing.assert_allclose(np.asarray(out), np.asarray(ref),
                               rtol=5e-2, atol=5e-2)
    print("KERNEL_OK")
</pallas_src>

<mosaic_0001>
module attributes {stable_mosaic.version = 11 : i64} {
  func.func @dense_layer_kernel(%arg0: i32, %arg1: memref<32x64xf32, #tpu.memory_space<vmem>>, %arg2: memref<1x64xf32, #tpu.memory_space<vmem>>, %arg3: memref<192x256xbf16, #tpu.memory_space<vmem>>, %arg4: memref<1x256xf32, #tpu.memory_space<vmem>>, %arg5: memref<32x256xf32, #tpu.memory_space<vmem>>) attributes {dimension_semantics = [#tpu.dimension_semantics<parallel>], iteration_bounds = array<i64: 1>, scalar_prefetch = 0 : i64, scratch_operands = 0 : i64, tpu.core_type = #tpu.core_type<tc>, window_params = [{transform_indices = @transform_0, window_bounds = array<i64: 32, 64>}, {pipeline_mode = #tpu.pipeline_mode<synchronous>, transform_indices = @transform_1, window_bounds = array<i64: 1, 64>}, {pipeline_mode = #tpu.pipeline_mode<synchronous>, transform_indices = @transform_2, window_bounds = array<i64: 192, 256>}, {pipeline_mode = #tpu.pipeline_mode<synchronous>, transform_indices = @transform_3, window_bounds = array<i64: 1, 256>}, {transform_indices = @transform_4, window_bounds = array<i64: 32, 256>}]} {
    %c0 = arith.constant 0 : index
    %c0_0 = arith.constant 0 : index
    %0 = vector.load %arg1[%c0, %c0_0] : memref<32x64xf32, #tpu.memory_space<vmem>>, vector<32x64xf32>
    %c0_1 = arith.constant 0 : index
    %c0_2 = arith.constant 0 : index
    %1 = vector.load %arg2[%c0_1, %c0_2] : memref<1x64xf32, #tpu.memory_space<vmem>>, vector<1x64xf32>
    %2 = vector.broadcast %1 : vector<1x64xf32> to vector<32x64xf32>
    %3 = arith.addf %0, %2 : vector<32x64xf32>
    %cst = arith.constant 0.000000e+00 : f32
    %4 = vector.broadcast %cst : f32 to vector<32x64xf32>
    %5 = arith.maximumf %3, %4 : vector<32x64xf32>
    %6 = tpu.iota {dimensions = array<i32: 0>} : vector<32x64xi32>
    %c16_i32 = arith.constant 16 : i32
    %c0_i32 = arith.constant 0 : i32
    %7 = arith.cmpi eq, %c16_i32, %c0_i32 : i32
    %c1_i32 = arith.constant 1 : i32
    %8 = arith.select %7, %c1_i32, %c16_i32 : i32
    %9 = vector.broadcast %8 : i32 to vector<32x64xi32>
    %10 = arith.remsi %6, %9 : vector<32x64xi32>
    %c0_i32_3 = arith.constant 0 : i32
    %11 = vector.broadcast %c0_i32_3 : i32 to vector<32x64xi32>
    %12 = arith.cmpi ne, %10, %11 : vector<32x64xi32>
    %c0_i32_4 = arith.constant 0 : i32
    %13 = vector.broadcast %c0_i32_4 : i32 to vector<32x64xi32>
    %14 = arith.cmpi slt, %10, %13 : vector<32x64xi32>
    %c0_i32_5 = arith.constant 0 : i32
    %15 = arith.cmpi slt, %8, %c0_i32_5 : i32
    %16 = vector.broadcast %15 : i1 to vector<32x64xi1>
    %17 = vector.broadcast %16 : vector<32x64xi1> to vector<32x64xi1>
    %18 = arith.xori %14, %17 : vector<32x64xi1>
    %19 = arith.andi %18, %12 : vector<32x64xi1>
    %20 = vector.broadcast %8 : i32 to vector<32x64xi32>
    %21 = arith.addi %10, %20 : vector<32x64xi32>
    %22 = arith.select %19, %21, %10 : vector<32x64xi1>, vector<32x64xi32>
    %c0_i32_6 = arith.constant 0 : i32
    %23 = vector.broadcast %c0_i32_6 : i32 to vector<32x64xi32>
    %24 = arith.cmpi eq, %22, %23 : vector<32x64xi32>
    %c1_i32_7 = arith.constant 1 : i32
    %25 = tpu.dynamic_rotate %5 by %c1_i32_7 dim 0 : vector<32x64xf32>, i32 -> vector<32x64xf32>
    %cst_8 = arith.constant 0.000000e+00 : f32
    %26 = vector.broadcast %cst_8 : f32 to vector<32x64xf32>
    %27 = arith.select %24, %26, %25 : vector<32x64xi1>, vector<32x64xf32>
    %c16_i32_9 = arith.constant 16 : i32
    %c0_i32_10 = arith.constant 0 : i32
    %28 = arith.cmpi eq, %c16_i32_9, %c0_i32_10 : i32
    %c1_i32_11 = arith.constant 1 : i32
    %29 = arith.select %28, %c1_i32_11, %c16_i32_9 : i32
    %30 = vector.broadcast %29 : i32 to vector<32x64xi32>
    %31 = arith.remsi %6, %30 : vector<32x64xi32>
    %c0_i32_12 = arith.constant 0 : i32
    %32 = vector.broadcast %c0_i32_12 : i32 to vector<32x64xi32>
    %33 = arith.cmpi ne, %31, %32 : vector<32x64xi32>
    %c0_i32_13 = arith.constant 0 : i32
    %34 = vector.broadcast %c0_i32_13 : i32 to vector<32x64xi32>
    %35 = arith.cmpi slt, %31, %34 : vector<32x64xi32>
    %c0_i32_14 = arith.constant 0 : i32
    %36 = arith.cmpi slt, %29, %c0_i32_14 : i32
    %37 = vector.broadcast %36 : i1 to vector<32x64xi1>
    %38 = vector.broadcast %37 : vector<32x64xi1> to vector<32x64xi1>
    %39 = arith.xori %35, %38 : vector<32x64xi1>
    %40 = arith.andi %39, %33 : vector<32x64xi1>
    %41 = vector.broadcast %29 : i32 to vector<32x64xi32>
    %42 = arith.addi %31, %41 : vector<32x64xi32>
    %43 = arith.select %40, %42, %31 : vector<32x64xi1>, vector<32x64xi32>
    %c15_i32 = arith.constant 15 : i32
    %44 = vector.broadcast %c15_i32 : i32 to vector<32x64xi32>
    %45 = arith.cmpi eq, %43, %44 : vector<32x64xi32>
    %c31_i32 = arith.constant 31 : i32
    %46 = tpu.dynamic_rotate %5 by %c31_i32 dim 0 : vector<32x64xf32>, i32 -> vector<32x64xf32>
    %cst_15 = arith.constant 0.000000e+00 : f32
    %47 = vector.broadcast %cst_15 : f32 to vector<32x64xf32>
    %48 = arith.select %45, %47, %46 : vector<32x64xi1>, vector<32x64xf32>
    %49 = tpu.concatenate %27, %5, %48 in 1 : vector<32x64xf32>, vector<32x64xf32>, vector<32x64xf32> -> vector<32x192xf32>
    %50 = arith.truncf %49 : vector<32x192xf32> to vector<32x192xbf16>
    %c0_16 = arith.constant 0 : index
    %c0_17 = arith.constant 0 : index
    %51 = vector.load %arg3[%c0_16, %c0_17] : memref<192x256xbf16, #tpu.memory_space<vmem>>, vector<192x256xbf16>
    %cst_18 = arith.constant dense<0.000000e+00> : vector<32x256xf32>
    %52 = tpu.matmul %50, %51, %cst_18 {dimension_numbers = #tpu.dot_dimension_numbers<[1], [0], [0], [1], [0, 0, 1, 1], [], []>} : vector<32x192xbf16>, vector<192x256xbf16>, vector<32x256xf32> -> vector<32x256xf32>
    %c0_19 = arith.constant 0 : index
    %c0_20 = arith.constant 0 : index
    %53 = vector.load %arg4[%c0_19, %c0_20] : memref<1x256xf32, #tpu.memory_space<vmem>>, vector<1x256xf32>
    %54 = vector.broadcast %53 : vector<1x256xf32> to vector<32x256xf32>
    %55 = arith.addf %52, %54 : vector<32x256xf32>
    %c0_21 = arith.constant 0 : index
    %c0_22 = arith.constant 0 : index
    %56 = vector.load %arg5[%c0_21, %c0_22] : memref<32x256xf32, #tpu.memory_space<vmem>>, vector<32x256xf32>
    tpu.vector_store %arg5[%c0_21, %c0_22], %55 {strides = array<i32>} : memref<32x256xf32, #tpu.memory_space<vmem>>, vector<32x256xf32>,
    return
  }
  func.func @transform_0(%arg0: i32) -> (i32, i32) {
    %c0_i32 = arith.constant 0 : i32
    %c0_i32_0 = arith.constant 0 : i32
    return %arg0, %c0_i32 : i32, i32
  }
  func.func @transform_1(%arg0: i32) -> (i32, i32) {
    %c0_i32 = arith.constant 0 : i32
    %c0_i32_0 = arith.constant 0 : i32
    %c0_i32_1 = arith.constant 0 : i32
    return %c0_i32, %c0_i32_0 : i32, i32
  }
  func.func @transform_2(%arg0: i32) -> (i32, i32) {
    %c0_i32 = arith.constant 0 : i32
    %c0_i32_0 = arith.constant 0 : i32
    %c0_i32_1 = arith.constant 0 : i32
    return %c0_i32, %c0_i32_0 : i32, i32
  }
  func.func @transform_3(%arg0: i32) -> (i32, i32) {
    %c0_i32 = arith.constant 0 : i32
    %c0_i32_0 = arith.constant 0 : i32
    %c0_i32_1 = arith.constant 0 : i32
    return %c0_i32, %c0_i32_0 : i32, i32
  }
  func.func @transform_4(%arg0: i32) -> (i32, i32) {
    %c0_i32 = arith.constant 0 : i32
    %c0_i32_0 = arith.constant 0 : i32
    return %arg0, %c0_i32 : i32, i32
  }
}

</mosaic_0001>

<bundles_post_ra>
// kernel: tpu_custom_call.1
= control target key start
LH: loop header
LB: loop body
LE: loop exit
PB: predicated region body
PF: predicated region fallthrough
CT: control target
= control target key end

     0   :  { %9 = vsyncpa [#allocation3], 0  ;;  %s727_s0 = inlined_call_operand.hbm [shape: f32[32,64], index: 0, kind: input, shape index: {}]   ;;  %s728_s1 = inlined_call_operand.vmem [shape: f32[1,64], index: 1, kind: input, shape index: {}]   ;;  %s729_s2 = inlined_call_operand.hbm [shape: bf16[192,256], index: 2, kind: input, shape index: {}]   ;;  %s730_s3 = inlined_call_operand.vmem [shape: f32[1,256], index: 3, kind: input, shape index: {}]   ;;  %s731_s4 = inlined_call_operand.hbm [shape: f32[32,256], index: 4, kind: output, shape index: {}]  }
   0x1   :  { %10 = vsyncpa [#allocation6], 0 }
   0x2   :  { %11 = vsyncpa [#allocation4], 0  ;;  %s596_s15 = smov [#allocation2]   ;;  %s524_s19 = scalar_lea.hbm %s727_s0, 512 }
   0x3   :  { %s17_s16 = sshll.u32 %s596_s15, 4  ;;  %p525_p0 = scmp.ne.s32.totalorder %s727_s0, %s524_s19  ;;  %s18_s16 = int_to_ptr.vmem [resolvable:$true] %s17_s16 }
   0x4   :  { %p528_p1 = scmp.lt.u32.totalorder %s524_s19, %s727_s0 }
   0x6   :  { %p530_p2 = pnand %p528_p1, %p525_p0 }
   0x8   :  { %533 = shalt.err (!%p530_p2)
}
   0x9   :  { %s534_s24 = scalar_lea.vmem %s18_s16, 512  ;;  %p539_p4 = scmp.lt.s32.totalorder %s18_s16, %s18_s16 }
   0xa   :  { %p535_p3 = scmp.ne.s32.totalorder %s18_s16, %s534_s24  ;;  %p540_p5 = scmp.lt.s32.totalorder %s534_s24, %s534_s24 }
   0xc   :  { %p541_p6 = por %p540_p5, %p539_p4 }
   0xe   :  { %p542_p7 = pnand %p541_p6, %p535_p3 }
  0x10   :  { %545 = shalt.err (!%p542_p7)
}
  0x11   :  { %s597_s25 = smov 128   ;;  %s598_s26 = smov 8  }
  0x12   :  { %23 = dma.hbm_to_vmem [thread:$0]  %s727_s0, 512, %s18_s16, [#allocation3], %s597_s25, %s597_s25, %s598_s26  }
  0x13   :  { %s599_s29 = smov [#allocation5]   ;;  %s546_s7 = scalar_lea.hbm %s729_s2, 3072 }
  0x14   :  { %s31_s30 = sshll.u32 %s599_s29, 4  ;;  %p547_p8 = scmp.ne.s32.totalorder %s729_s2, %s546_s7  ;;  %s32_s30 = int_to_ptr.vmem [resolvable:$true] %s31_s30 }
  0x15   :  { %p550_p9 = scmp.lt.u32.totalorder %s546_s7, %s729_s2 }
  0x17   :  { %p552_p10 = pnand %p550_p9, %p547_p8 }
  0x19   :  { %555 = shalt.err (!%p552_p10)
}
  0x1a   :  { %s556_s12 = scalar_lea.vmem %s32_s30, 3072  ;;  %p561_p12 = scmp.lt.s32.totalorder %s32_s30, %s32_s30 }
  0x1b   :  { %p557_p11 = scmp.ne.s32.totalorder %s32_s30, %s556_s12  ;;  %p562_p13 = scmp.lt.s32.totalorder %s556_s12, %s556_s12 }
  0x1d   :  { %p563_p0 = por %p562_p13, %p561_p12 }
  0x1f   :  { %p564_p1 = pnand %p563_p0, %p557_p11 }
  0x21   :  { %567 = shalt.err (!%p564_p1)
}
  0x22   :  { %37 = dma.hbm_to_vmem [thread:$0]  %s729_s2, 3072, %s32_s30, [#allocation6], %s597_s25, %s597_s25, %s598_s26  }
  0x23   :  { %590 = dma.done.wait [#allocation3], 512  }
  0x24   :  { %591 = vsyncadd [#allocation3], 4294966784 }
  0x25   :  { %592 = dma.done.wait [#allocation6], 3072  }
  0x26   :  { %593 = vsyncadd [#allocation6], 4294964224  ;;  %v66_v0 = vlaneseq  ;;  %v47_v3 = vld [vmem:[#allocation2] sm:$0xff]  ;;  %v48_v4 = vld [vmem:[#allocation2 + $0x8] sm:$0xff]  ;;  %vm169_vm4 = vcmask 523264   ;;  %s601_s17 = smov [#allocation7]  }
  0x27   :  { %v419_v5 = vld [vmem:[%s728_s1] ss:$0 sm:$0xff]  ;;  %v49_v9 = vld [vmem:[#allocation2 + $0x10] sm:$0xff]  ;;  %v50_v10 = vld [vmem:[#allocation2 + $0x18] sm:$0xff]  ;;  %s600_s1 = smov 64   ;;  %s406_s18 = sshll.u32 %s601_s17, 4  ;;  %s407_s18 = int_to_ptr.vmem [resolvable:$true] %s406_s18 }
  0x28   :  { %v653_v1 = vshrl.u32 %v66_v0, 7  ;;  %v58_v7 = vadd.f32 %v419_v5, %v47_v3  ;;  %v59_v8 = vadd.f32 %v419_v5, %v48_v4  ;;  %v60_v12 = vadd.f32 %v419_v5, %v49_v9  ;;  %v488_v14 = vld [vmem:[#allocation5 + $0x4] ss:$8 sps:$4 sm:$0xff]   ;;  %v490_v15 = vld [vmem:[#allocation5] ss:$8 sps:$4 sm:$0xff]   ;;  %p573_p3 = scmp.lt.s32.totalorder %s407_s18, %s407_s18 }
  0x29   :  { %v61_v13 = vadd.f32 %v419_v5, %v50_v10  ;;  %v491_v18 = vld [vmem:[#allocation5 + $0x14] ss:$8 sps:$4 sm:$0xff]   ;;  %340 = vmatprep.subr.bf16.mxu0 %v488_v14  ;;  %446 = vmatprep.subr.bf16.mxu1 %v488_v14  ;;  %v493_v25 = vld [vmem:[#allocation5 + $0x10] ss:$8 sps:$4 sm:$0xff]   ;;  %v494_v27 = vld [vmem:[#allocation5 + $0x24] ss:$8 sps:$4 sm:$0xff]  }
  0x2a   :  { %v68_v2 = vadd.s32 8, %v653_v1  ;;  %v70_v6 = vadd.s32 24, %v653_v1  ;;  %vm144_vm0 = vcmp.lt.s32.totalorder %v653_v1, 7  ;;  %v62_v16 = vmax.f32 %v58_v7, 0.0  ;;  %341 = vmatpush1.bf16.msra.mxu0 %v490_v15  ;;  %458 = vmatpush1.bf16.msra.mxu1 %v490_v15  ;;  %v496_v37 = vld [vmem:[#allocation5 + $0x20] ss:$8 sps:$4 sm:$0xff]  }
  0x2b   :  { %v63_v17 = vmax.f32 %v59_v8, 0.0  ;;  %v64_v19 = vmax.f32 %v60_v12, 0.0  ;;  %v65_v20 = vmax.f32 %v61_v13, 0.0  ;;  %vm127_vm1 = vcmp.lt.s32.totalorder %v653_v1, 1  ;;  %342 = vmatprep.subr.bf16.mxu0 %v491_v18  ;;  %447 = vmatprep.subr.bf16.mxu1 %v491_v18  ;;  %v497_v40 = vld [vmem:[#allocation5 + $0x34] ss:$8 sps:$4 sm:$0xff]  }
  0x2c   :  { %v82_v11 = vand.u32 15, %v68_v2  ;;  %v96_v21 = vand.u32 15, %v70_v6  ;;  %v123_v24 = vrot.slane %v62_v16, 7  ;;  %v140_v28 = vrot.slane %v62_v16, 1  ;;  %v499_v48 = vld [vmem:[#allocation5 + $0x30] ss:$8 sps:$4 sm:$0xff]  }
  0x2d   :  { %v124_v22 = vrot.slane %v63_v17, 7  ;;  %v478_v23 = vpack.i.bf16 %v63_v17, %v62_v16  ;;  %v141_v29 = vrot.slane %v63_v17, 1  ;;  %v483_v30 = vpack.i.bf16 %v65_v20, %v64_v19  ;;  %v500_v51 = vld [vmem:[#allocation5 + $0x44] ss:$8 sps:$4 sm:$0xff]   ;;  %v502_v52 = vld [vmem:[#allocation5 + $0x40] ss:$8 sps:$4 sm:$0xff]  }
  0x2e   :  { %vm662_vm2 = vcmp.eq.s32.totalorder %v82_v11, 15  ;;  %v142_v31 = vrot.slane %v64_v19, 1  ;;  %v126_v32 = vrot.slane %v65_v20, 7  ;;  %vm672_vm3 = vcmp.eq.s32.totalorder %v96_v21, 15  ;;  %343 = vmatpush1.bf16.msra.mxu0 %v493_v25  ;;  %459 = vmatpush1.bf16.msra.mxu1 %v493_v25  ;;  %v503_v53 = vld [vmem:[#allocation5 + $0x54] ss:$8 sps:$4 sm:$0xff]  }
  0x2f   :  { %479 = vrot.lane.b32.xlu0 %v478_v23, %s600_s1  ;;  %v668_v33 = vsel %vm127_vm1, %v123_v24, %v124_v22  ;;  %v147_v34 = vsel %vm144_vm0, %v140_v28, %v141_v29  ;;  %v143_v36 = vrot.slane %v65_v20, 1  ;;  %344 = vmatprep.subr.bf16.mxu0 %v494_v27  ;;  %v125_v46 = vrot.slane %v64_v19, 7  ;;  %v505_v54 = vld [vmem:[#allocation5 + $0x50] ss:$8 sps:$4 sm:$0xff]   ;;  %v506_v55 = vld [vmem:[#allocation5 + $0x64] ss:$8 sps:$4 sm:$0xff]  }
  0x30   :  { %v146_v38 = vsel %vm144_vm0, %v141_v29, %v142_v31  ;;  %v680_v39 = vsel %vm127_vm1, %v126_v32, %v123_v24  ;;  %448 = vmatprep.subr.bf16.mxu1 %v494_v27  ;;  %v508_v56 = vld [vmem:[#allocation5 + $0x60] ss:$8 sps:$4 sm:$0xff]   ;;  %v509_v57 = vld [vmem:[#allocation5 + $0x74] ss:$8 sps:$4 sm:$0xff]   ;;  %v511_v58 = vld [vmem:[#allocation5 + $0x70] ss:$8 sps:$4 sm:$0xff]  }
  0x31   :  { %v150_v41 = vsel %vm662_vm2, 0.0, %v146_v38  ;;  %v145_v42 = vsel %vm144_vm0, %v142_v31, %v143_v36  ;;  %v148_v43 = vsel %vm144_vm0, %v143_v36, %v140_v28  ;;  %v692_v49 = vsel %vm127_vm1, %v125_v46, %v126_v32  ;;  %v512_v59 = vld [vmem:[#allocation5 + $0x84] ss:$8 sps:$4 sm:$0xff]   ;;  %v514_v60 = vld [vmem:[#allocation5 + $0x80] ss:$8 sps:$4 sm:$0xff]  }
  0x32   :  { %v175_v44 = vpack.c.bf16 %v150_v41, %v147_v34  ;;  %v152_v45 = vsel %vm672_vm3, 0.0, %v148_v43  ;;  %345 = vmatpush1.bf16.msra.mxu0 %v496_v37  ;;  %460 = vmatpush1.bf16.msra.mxu1 %v496_v37  ;;  %v696_v50 = vsel %vm127_vm1, %v124_v22, %v125_v46  ;;  %v515_v61 = vld [vmem:[#allocation5 + $0x94] ss:$8 sps:$4 sm:$0xff]   ;;  %v517_v62 = vld [vmem:[#allocation5 + $0x90] ss:$8 sps:$4 sm:$0xff]   ;;  %v75_v4 = vand.u32 15, %v653_v1 }
  0x33   :  { %484 = vrot.lane.b32.xlu0 %v483_v30, %s600_s1  ;;  %v177_v47 = vpack.c.bf16 %v152_v45, %v145_v42  ;;  %346 = vmatprep.subr.bf16.mxu0 %v497_v40  ;;  %v518_v63 = vld [vmem:[#allocation5 + $0xa4] ss:$8 sps:$4 sm:$0xff]   ;;  %v520_v0 = vld [vmem:[#allocation5 + $0xa0] ss:$8 sps:$4 sm:$0xff]   ;;  %v521_v2 = vld [vmem:[#allocation5 + $0xb4] ss:$8 sps:$4 sm:$0xff]  }
  0x34   :  { %449 = vmatprep.subr.bf16.mxu1 %v497_v40  ;;  %444 = vmatprep.mubr.msk.bf16.mxu0 %vm169_vm4, %v175_v44  ;;  %v523_v3 = vld [vmem:[#allocation5 + $0xb0] ss:$8 sps:$4 sm:$0xff]   ;;  %v69_v5 = vadd.s32 16, %v653_v1  ;;  %vm119_vm5 = vcmp.eq.s32.totalorder %v75_v4, 0  ;;  %v206_v21 = vsub.s32 0, %v653_v1  ;;  %v210_v23 = vsub.s32 1, %v653_v1 }
  0x35   :  { %445 = vmatprep.mubr.msk.bf16.mxu1 %vm169_vm4, %v177_v47  ;;  %v132_v8 = vsel %vm119_vm5, 0.0, %v680_v39  ;;  %v202_v22 = vld [vmem:[%s730_s3] sm:$0x3]  ;;  %s568_s3 = scalar_lea.vmem %s407_s18, 1024 }
  0x36   :  { %347 = vmatpush1.bf16.msra.mxu0 %v499_v48  ;;  %461 = vmatpush1.bf16.msra.mxu1 %v499_v48  ;;  %v89_v6 = vand.u32 15, %v69_v5  ;;  %v207_v24 = vrot.slane %v202_v22, %v206_v21  ;;  %v211_v25 = vrot.slane %v202_v22, %v210_v23  ;;  %p569_p2 = scmp.ne.s32.totalorder %s407_s18, %s568_s3  ;;  %p574_p4 = scmp.lt.s32.totalorder %s568_s3, %s568_s3 }
  0x37   :  { %348 = vmatprep.subr.bf16.mxu0 %v500_v51  ;;  %450 = vmatprep.subr.bf16.mxu1 %v500_v51 }
  0x38   :  { %vm121_vm6 = vcmp.eq.s32.totalorder %v89_v6, 0  ;;  %p575_p5 = por %p574_p4, %p573_p3 }
  0x39   :  { %v134_v15 = vsel %vm121_vm6, 0.0, %v696_v50 }
  0x3a   :  { %349 = vmatpush1.bf16.msra.mxu0 %v502_v52  ;;  %462 = vmatpush1.bf16.msra.mxu1 %v502_v52  ;;  %p576_p6 = pnand %p575_p5, %p569_p2 }
  0x3b   :  { %350 = vmatprep.subr.bf16.mxu0 %v503_v53  ;;  %451 = vmatprep.subr.bf16.mxu1 %v503_v53 }
  0x3e   :  { %351 = vmatpush1.bf16.msra.mxu0 %v505_v54  ;;  %463 = vmatpush1.bf16.msra.mxu1 %v505_v54 }
  0x3f   :  { %352 = vmatprep.subr.bf16.mxu0 %v506_v55  ;;  %452 = vmatprep.subr.bf16.mxu1 %v506_v55 }
  0x42   :  { %353 = vmatpush1.bf16.msra.mxu0 %v508_v56  ;;  %464 = vmatpush1.bf16.msra.mxu1 %v508_v56 }
  0x43   :  { %354 = vmatprep.subr.bf16.mxu0 %v509_v57  ;;  %453 = vmatprep.subr.bf16.mxu1 %v509_v57 }
  0x46   :  { %355 = vmatpush1.bf16.msra.mxu0 %v511_v58  ;;  %465 = vmatpush1.bf16.msra.mxu1 %v511_v58 }
  0x47   :  { %356 = vmatprep.subr.bf16.mxu0 %v512_v59  ;;  %454 = vmatprep.subr.bf16.mxu1 %v512_v59 }
  0x4a   :  { %357 = vmatpush1.bf16.msra.mxu0 %v514_v60  ;;  %466 = vmatpush1.bf16.msra.mxu1 %v514_v60 }
  0x4b   :  { %358 = vmatprep.subr.bf16.mxu0 %v515_v61  ;;  %455 = vmatprep.subr.bf16.mxu1 %v515_v61 }
  0x4e   :  { %359 = vmatpush1.bf16.msra.mxu0 %v517_v62  ;;  %467 = vmatpush1.bf16.msra.mxu1 %v517_v62 }
  0x4f   :  { %360 = vmatprep.subr.bf16.mxu0 %v518_v63  ;;  %456 = vmatprep.subr.bf16.mxu1 %v518_v63 }
  0x52   :  { %361 = vmatpush1.bf16.msra.mxu0 %v520_v0  ;;  %468 = vmatpush1.bf16.msra.mxu1 %v520_v0 }
  0x53   :  { %362 = vmatprep.subr.bf16.mxu0 %v521_v2  ;;  %457 = vmatprep.subr.bf16.mxu1 %v521_v2 }
  0x56   :  { %363 = vmatpush1.bf16.msra.mxu0 %v523_v3  ;;  %469 = vmatpush1.bf16.msra.mxu1 %v523_v3 }
  0xa1   :  { %v480_v7 = vpop.permute.xlu0 %479 }
  0xa2   :  { %v482_v9 = vunpack.i.h.bf16 %v480_v7  ;;  %v481_v10 = vunpack.i.l.bf16 %v480_v7 }
  0xa4   :  { %v170_v11 = vsel %vm169_vm4, %v132_v8, %v481_v10  ;;  %v171_v12 = vsel %vm169_vm4, %v668_v33, %v482_v9 }
  0xa5   :  { %v485_v13 = vpop.permute.xlu0 %484  ;;  %v174_v14 = vpack.c.bf16 %v171_v12, %v170_v11 }
  0xa6   :  { %v487_v16 = vunpack.i.h.bf16 %v485_v13  ;;  %v486_v17 = vunpack.i.l.bf16 %v485_v13 }
  0xa7   :  { %373 = vmatmul.mubr.bf16.vlgmr.msra.gmra.mrb[0].mxu0 %v174_v14 }
  0xa8   :  { %v172_v18 = vsel %vm169_vm4, %v134_v15, %v486_v17  ;;  %v173_v19 = vsel %vm169_vm4, %v692_v49, %v487_v16 }
  0xa9   :  { %v176_v20 = vpack.c.bf16 %v173_v19, %v172_v18 }
  0xab   :  { %383 = vmatmul.mubr.bf16.vlgmr.msra.gmra.mrb[0].mxu1 %v176_v20 }
 0x17a   :  { %v374_v26 = vpop.f32.mrb[0].mxu0 }
 0x17b   :  { %v375_v27 = vadd.f32 %v374_v26, %v207_v24  ;;  %v376_v28 = vpop.f32.mrb[1].mxu0 }
 0x17c   :  { %v377_v29 = vadd.f32 %v376_v28, %v211_v25  ;;  %v378_v30 = vpop.f32.mrb[2].mxu0 }
 0x17d   :  { %393 = vst [vmem:[#allocation7] sm:$0xff] %v375_v27  ;;  %v379_v31 = vadd.f32 %v378_v30, %v207_v24  ;;  %v380_v32 = vpop.f32.mrb[3].mxu0 }
 0x17e   :  { %394 = vst [vmem:[#allocation7 + $0x8] sm:$0xff] %v377_v29  ;;  %v381_v33 = vadd.f32 %v380_v32, %v211_v25  ;;  %v384_v34 = vpop.f32.mrb[0].mxu1 }
 0x17f   :  { %395 = vst [vmem:[#allocation7 + $0x10] sm:$0xff] %v379_v31  ;;  %v385_v35 = vadd.f32 %v384_v34, %v207_v24  ;;  %v386_v36 = vpop.f32.mrb[1].mxu1 }
 0x180   :  { %396 = vst [vmem:[#allocation7 + $0x18] sm:$0xff] %v381_v33  ;;  %v387_v1 = vadd.f32 %v386_v36, %v211_v25  ;;  %v388_v37 = vpop.f32.mrb[2].mxu1 }
 0x181   :  { %397 = vst [vmem:[#allocation7 + $0x20] sm:$0xff] %v385_v35  ;;  %v389_v38 = vadd.f32 %v388_v37, %v207_v24  ;;  %v390_v39 = vpop.f32.mrb[3].mxu1 }
 0x182   :  { %398 = vst [vmem:[#allocation7 + $0x28] sm:$0xff] %v387_v1  ;;  %v391_v40 = vadd.f32 %v390_v39, %v211_v25 }
 0x183   :  { %399 = vst [vmem:[#allocation7 + $0x30] sm:$0xff] %v389_v38 }
 0x184   :  { %400 = vst [vmem:[#allocation7 + $0x38] sm:$0xff] %v391_v40 }
 0x185   :  { %579 = shalt.err (!%p576_p6)
}
 0x186   :  { %s580_s21 = scalar_lea.hbm %s731_s4, 1024 }
 0x187   :  { %p581_p7 = scmp.ne.s32.totalorder %s731_s4, %s580_s21  ;;  %p584_p8 = scmp.lt.u32.totalorder %s580_s21, %s731_s4 }
 0x189   :  { %p586_p9 = pnand %p584_p8, %p581_p7 }
 0x18b   :  { %589 = shalt.err (!%p586_p9)
}
 0x18c   :  { %s602_s26 = smov 256   ;;  %s603_s27 = smov 16  }
 0x18d   :  { %412 = dma.vmem_to_hbm [thread:$0]  %s407_s18, 1024, %s731_s4, [#allocation4], %s602_s26, %s602_s26, %s603_s27  }
 0x18e   :  { %594 = dma.done.wait [#allocation4], 1024  }
 0x18f   :  { %595 = vsyncadd [#allocation4], 4294966272 }
 0x190   :  { %416 = vsyncpa [#allocation3], 1 }
 0x191   :  { %417 = vsyncpa [#allocation6], 1 }
 0x192   :  { %418 = vsyncpa [#allocation4], 1 }

</bundles_post_ra>
